<compile_context>
chip_gen: v6e
topology: v6e:2x2x1
jax: 0.10.0
libtpu: 0.0.40
codegen_flags: <defaults>
</compile_context>

<pallas_src>
import functools

import jax
import jax.numpy as jnp
from jax import lax
from jax.experimental import pallas as pl
from jax.experimental.pallas import tpu as pltpu


def _round_up(x, m):
    return (x + m - 1) // m * m


def _supcon_kernel(q_ref, k_ref, lab_q_ref, lab_k_ref, out_ref,
                   m_ref, l_ref, s_ref, cnt_ref, *, batch, pad):
    """Flash-style SupCon row-contribution kernel.

    q_ref:     (tile, D)  row features, pre-scaled by 1/temperature.
    k_ref:     (Bp, D)    full column features, resident in VMEM.
    lab_q_ref: (tile, 1)  row labels;  lab_k_ref: (1, tile) column labels.
    out_ref:   (tile, 1)  per-row  sum_j mask_norm * log_probs.
    """
    i = pl.program_id(0)          # row tile (parallel)
    j = pl.program_id(1)          # column tile (reduction axis, arbitrary)
    nj = pl.num_programs(1)
    tile = q_ref.shape[0]

    @pl.when(j == 0)
    def _init():
        m_ref[...] = jnp.full_like(m_ref, -1e30)
        l_ref[...] = jnp.zeros_like(l_ref)
        s_ref[...] = jnp.zeros_like(s_ref)
        cnt_ref[...] = jnp.zeros_like(cnt_ref)

    # Column slice of the VMEM-resident K matrix (sublane slice, tile-aligned).
    col0 = pl.multiple_of(j * tile, tile)
    k = k_ref[pl.ds(col0, tile), :]

    # logits tile on the MXU (bf16 in by default, f32 accumulation). No
    # per-element temperature scale: it is folded into q in the wrapper.
    logits = lax.dot_general(q_ref[...], k, (((1,), (1,)), ((), ())),
                             preferred_element_type=jnp.float32)

    lab_eq = lab_q_ref[...] == lab_k_ref[...]          # (tile, tile) bool

    def update(logits_m, pos, exp_mask=None):
        # --- online softmax statistics over the column axis ---
        m_prev = m_ref[...]
        m_new = jnp.maximum(m_prev, jnp.max(logits_m, axis=-1, keepdims=True))
        alpha = jnp.exp(m_prev - m_new)
        p = jnp.exp(logits_m - m_new)
        if exp_mask is not None:
            # Guard the degenerate all-masked-row case (m_new still -1e30).
            p = jnp.where(exp_mask, p, 0.0)
        l_ref[...] = l_ref[...] * alpha + jnp.sum(p, axis=-1, keepdims=True)
        m_ref[...] = m_new
        # --- positives: sum(mask*logits) and positive counts, no float mask ---
        s_ref[...] += jnp.sum(jnp.where(pos, logits_m, 0.0),
                              axis=-1, keepdims=True)
        cnt_ref[...] += jnp.sum(jnp.where(pos, 1.0, 0.0),
                                axis=-1, keepdims=True)

    # Mask fast path: only the diagonal tile needs self-contrast exclusion and
    # only the last column tile (when there is padding) needs col < batch.
    if pad > 0:
        needs_mask = (i == j) | (j == nj - 1)
    else:
        needs_mask = i == j

    @pl.when(needs_mask)
    def _masked_tile():
        row_ids = i * tile + lax.broadcasted_iota(jnp.int32, (tile, tile), 0)
        col_ids = col0 + lax.broadcasted_iota(jnp.int32, (tile, tile), 1)
        keep = (col_ids < batch) & (row_ids != col_ids)
        logits_m = jnp.where(keep, logits, jnp.float32(-1e30))  # finite mask
        update(logits_m, lab_eq & keep, exp_mask=keep)

    @pl.when(jnp.logical_not(needs_mask))
    def _interior_tile():
        # No padded columns and no diagonal here: skip iotas/compares/selects.
        update(logits, lab_eq)

    @pl.when(j == nj - 1)
    def _finalize():
        cnt = cnt_ref[...]
        lse = m_ref[...] + jnp.log(l_ref[...])                    # logsumexp
        mean_pos = s_ref[...] / jnp.maximum(cnt, 1.0)             # clamp(min=1)
        row0 = i * tile + lax.broadcasted_iota(jnp.int32, (tile, 1), 0)
        valid = (row0 < batch) & (cnt > 0.0)
        # sum_j mask_norm * log_probs (0 for padded rows / rows w/o positives)
        out_ref[...] = jnp.where(valid, mean_pos - lse, 0.0)


def supcon_loss(features, labels, temperature=0.07, *, block_b=256,
                matmul_dtype=jnp.bfloat16, vmem_limit_bytes=None):
    """SupCon forward (distributed=False). features: [B, D], labels: [B]."""
    B, D = features.shape

    # L2-normalize once (== torch F.normalize, p=2, eps=1e-12) and fold the
    # 1/temperature scale into the row (anchor) features.
    f = features.astype(jnp.float32)
    norm = jnp.maximum(jnp.sqrt(jnp.sum(f * f, axis=-1, keepdims=True)), 1e-12)
    k_feat = f / norm
    q_feat = k_feat * jnp.float32(1.0 / temperature)
    if matmul_dtype is not None:
        # Unit-norm features are safe in bf16; MXU runs at native bf16 rate.
        q_feat = q_feat.astype(matmul_dtype)
        k_feat = k_feat.astype(matmul_dtype)

    # Tile choice: one tile when it fits (split into two 128-aligned row tiles
    # for clean multiples of 256, so both v7x TensorCores get work), otherwise
    # lane-aligned block_b tiles.  Sweep block_b 256->512 on v6e; cap ~256 on
    # v5e; budget against 64 MiB VMEM on v7x.
    b8 = _round_up(B, 8)
    if b8 <= block_b:
        tile = b8 // 2 if (b8 % 256 == 0) else b8
    else:
        if block_b % 128 != 0:
            raise ValueError("block_b must be a multiple of 128 when tiling")
        tile = block_b
    Bp = _round_up(B, tile)
    pad = Bp - B

    lab = labels.astype(jnp.int32)
    if pad:
        q_feat = jnp.pad(q_feat, ((0, pad), (0, 0)))
        k_feat = jnp.pad(k_feat, ((0, pad), (0, 0)))
        lab = jnp.pad(lab, ((0, pad),), constant_values=-1)
    lab_col = lab.reshape(Bp, 1)
    lab_row = lab.reshape(1, Bp)

    n_tiles = Bp // tile
    kernel = functools.partial(_supcon_kernel, batch=B, pad=pad)

    itemsize = jnp.dtype(q_feat.dtype).itemsize
    # K resident in VMEM => each feature matrix crosses HBM exactly once.
    cost = pl.CostEstimate(
        flops=2 * Bp * Bp * D,
        transcendentals=Bp * Bp + 2 * Bp,
        bytes_accessed=int(2 * Bp * D * itemsize + (n_tiles + 2) * Bp * 4),
    )

    if vmem_limit_bytes is None:
        # resident K + double-buffered q/labels/out + scratch + spill headroom;
        # cap at 64 MiB so the auto value is safe on v7x as well.
        est = ((Bp * D + 4 * tile * D) * itemsize
               + 12 * tile * tile * 4 + (2 << 20))
        vmem_limit_bytes = int(min(max(est, 32 << 20), 64 << 20))

    contrib = pl.pallas_call(
        kernel,
        out_shape=jax.ShapeDtypeStruct((Bp, 1), jnp.float32),
        grid_spec=pltpu.PrefetchScalarGridSpec(
            num_scalar_prefetch=0,
            grid=(n_tiles, n_tiles),
            in_specs=[
                pl.BlockSpec((tile, D), lambda i, j: (i, 0)),        # q rows
                pl.BlockSpec(memory_space=pltpu.MemorySpace.VMEM),   # K resident
                pl.BlockSpec((tile, 1), lambda i, j: (i, 0)),        # row labels
                pl.BlockSpec((1, tile), lambda i, j: (0, j)),        # col labels
            ],
            out_specs=pl.BlockSpec((tile, 1), lambda i, j: (i, 0)),
            scratch_shapes=[pltpu.VMEM((tile, 1), jnp.float32)] * 4,
        ),
        compiler_params=pltpu.CompilerParams(
            dimension_semantics=("parallel", "arbitrary"),
            vmem_limit_bytes=vmem_limit_bytes),
        cost_estimate=cost,
    )(q_feat, k_feat, lab_col, lab_row)

    # loss = -mean over rows of sum_j mask_norm * log_probs
    return -jnp.sum(contrib) / jnp.float32(B)


def supcon_loss_ref(features, labels, temperature=0.07):
    """Pure-JAX reference mirroring the PyTorch module (non-distributed)."""
    f = features.astype(jnp.float32)
    f = f / jnp.maximum(jnp.linalg.norm(f, axis=-1, keepdims=True), 1e-12)
    B = f.shape[0]
    mask = (labels[:, None] == labels[None, :]).astype(jnp.float32)
    anchor = jnp.ones((B, B), jnp.float32) - jnp.eye(B, dtype=jnp.float32)
    mask = mask * anchor
    logits = (f @ f.T) / temperature
    logits = logits - (1.0 - anchor) * jnp.finfo(jnp.float32).max
    logits = logits - jnp.max(logits, axis=-1, keepdims=True)
    log_probs = logits - jnp.log(jnp.sum(jnp.exp(logits), axis=-1, keepdims=True))
    mask = mask / jnp.maximum(jnp.sum(mask, axis=-1, keepdims=True), 1.0)
    return -jnp.mean(jnp.sum(mask * log_probs, axis=-1))


if __name__ == "__main__":
    k0, k1, k2, k3, k4, k5 = jax.random.split(jax.random.PRNGKey(0), 6)

    # Case 1: tiny single-tile case (B=8, D=32), exact f32 math.
    B, D = 8, 32
    feats = jax.random.normal(k0, (B, D), dtype=jnp.float32)
    labs = jax.random.randint(k1, (B,), 0, 3, dtype=jnp.int32)
    loss = jax.block_until_ready(
        supcon_loss(feats, labs, temperature=0.07, matmul_dtype=None))
    ref = supcon_loss_ref(feats, labs, temperature=0.07)
    assert jnp.isfinite(loss), "kernel loss is not finite"
    assert jnp.allclose(loss, ref, rtol=1e-5, atol=1e-5), (loss, ref)

    # Case 2: multi-tile 2x2 grid with padded rows/cols (B=150 -> Bp=256),
    # f32 path — exercises online-softmax accumulation, resident-K slicing,
    # the diagonal/last-tile mask path and the interior fast path.
    B2, D2 = 150, 32
    f2 = jax.random.normal(k2, (B2, D2), dtype=jnp.float32)
    l2 = jax.random.randint(k3, (B2,), 0, 5, dtype=jnp.int32)
    loss2 = jax.block_until_ready(
        supcon_loss(f2, l2, temperature=0.07, block_b=128, matmul_dtype=None))
    ref2 = supcon_loss_ref(f2, l2, temperature=0.07)
    assert jnp.isfinite(loss2), "tiled kernel loss is not finite"
    assert jnp.allclose(loss2, ref2, rtol=1e-4, atol=1e-4), (loss2, ref2)

    # Case 3: default bf16 MXU path on the same shape (looser tolerance).
    loss3 = jax.block_until_ready(
        supcon_loss(f2, l2, temperature=0.07, block_b=128))
    assert jnp.isfinite(loss3), "bf16 kernel loss is not finite"
    assert jnp.allclose(loss3, ref2, rtol=5e-2, atol=1e-1), (loss3, ref2)

    # Case 4: pad-free batch (B=256) that is split into two row tiles
    # (v7x megacore path) with the bf16 default.
    B4, D4 = 256, 64
    f4 = jax.random.normal(k4, (B4, D4), dtype=jnp.float32)
    l4 = jax.random.randint(k5, (B4,), 0, 10, dtype=jnp.int32)
    loss4 = jax.block_until_ready(supcon_loss(f4, l4, temperature=0.07))
    ref4 = supcon_loss_ref(f4, l4, temperature=0.07)
    assert jnp.isfinite(loss4), "split-tile kernel loss is not finite"
    assert jnp.allclose(loss4, ref4, rtol=5e-2, atol=1e-1), (loss4, ref4)

    print("KERNEL_OK")
</pallas_src>

<mosaic_0001>
module attributes {stable_mosaic.version = 11 : i64} {
  func.func @_supcon_kernel(%arg0: i32, %arg1: i32, %arg2: memref<8x32xf32, #tpu.memory_space<vmem>>, %arg3: memref<8x32xf32, #tpu.memory_space<vmem>>, %arg4: memref<8x1xi32, #tpu.memory_space<vmem>>, %arg5: memref<1x8xi32, #tpu.memory_space<vmem>>, %arg6: memref<8x1xf32, #tpu.memory_space<vmem>>, %arg7: memref<8x1xf32, #tpu.memory_space<vmem>>, %arg8: memref<8x1xf32, #tpu.memory_space<vmem>>, %arg9: memref<8x1xf32, #tpu.memory_space<vmem>>, %arg10: memref<8x1xf32, #tpu.memory_space<vmem>>) attributes {dimension_semantics = [#tpu.dimension_semantics<parallel>, #tpu.dimension_semantics<arbitrary>], iteration_bounds = array<i64: 1, 1>, scalar_prefetch = 0 : i64, scratch_operands = 4 : i64, tpu.core_type = #tpu.core_type<tc>, window_params = [{transform_indices = @transform_0, window_bounds = array<i64: 8, 32>}, {pipeline_mode = #tpu.pipeline_mode<synchronous>, transform_indices = @transform_1, window_bounds = array<i64: 8, 32>}, {transform_indices = @transform_2, window_bounds = array<i64: 8, 1>}, {transform_indices = @transform_3, window_bounds = array<i64: 1, 8>}, {transform_indices = @transform_4, window_bounds = array<i64: 8, 1>}]} {
    %c0_i32 = arith.constant 0 : i32
    %0 = arith.cmpi eq, %arg1, %c0_i32 : i32
    %1 = arith.extui %0 : i1 to i32
    %c0_i32_0 = arith.constant 0 : i32
    %2 = arith.cmpi ne, %1, %c0_i32_0 : i32
    scf.if %2 {
      %cst_11 = arith.constant -1.000000e+30 : f32
      %23 = vector.broadcast %cst_11 : f32 to vector<8x1xf32>
      %c0_12 = arith.constant 0 : index
      %c0_13 = arith.constant 0 : index
      %24 = vector.load %arg7[%c0_12, %c0_13] : memref<8x1xf32, #tpu.memory_space<vmem>>, vector<8x1xf32>
      tpu.vector_store %arg7[%c0_12, %c0_13], %23 {strides = array<i32>} : memref<8x1xf32, #tpu.memory_space<vmem>>, vector<8x1xf32>,
      %cst_14 = arith.constant 0.000000e+00 : f32
      %25 = vector.broadcast %cst_14 : f32 to vector<8x1xf32>
      %c0_15 = arith.constant 0 : index
      %c0_16 = arith.constant 0 : index
      %26 = vector.load %arg8[%c0_15, %c0_16] : memref<8x1xf32, #tpu.memory_space<vmem>>, vector<8x1xf32>
      tpu.vector_store %arg8[%c0_15, %c0_16], %25 {strides = array<i32>} : memref<8x1xf32, #tpu.memory_space<vmem>>, vector<8x1xf32>,
      %cst_17 = arith.constant 0.000000e+00 : f32
      %27 = vector.broadcast %cst_17 : f32 to vector<8x1xf32>
      %c0_18 = arith.constant 0 : index
      %c0_19 = arith.constant 0 : index
      %28 = vector.load %arg9[%c0_18, %c0_19] : memref<8x1xf32, #tpu.memory_space<vmem>>, vector<8x1xf32>
      tpu.vector_store %arg9[%c0_18, %c0_19], %27 {strides = array<i32>} : memref<8x1xf32, #tpu.memory_space<vmem>>, vector<8x1xf32>,
      %cst_20 = arith.constant 0.000000e+00 : f32
      %29 = vector.broadcast %cst_20 : f32 to vector<8x1xf32>
      %c0_21 = arith.constant 0 : index
      %c0_22 = arith.constant 0 : index
      %30 = vector.load %arg10[%c0_21, %c0_22] : memref<8x1xf32, #tpu.memory_space<vmem>>, vector<8x1xf32>
      tpu.vector_store %arg10[%c0_21, %c0_22], %29 {strides = array<i32>} : memref<8x1xf32, #tpu.memory_space<vmem>>, vector<8x1xf32>,
    } else {
    }
    %c8_i32 = arith.constant 8 : i32
    %3 = arith.muli %arg1, %c8_i32 : i32
    %4 = tpu.assume_multiple %3, 8 : i32
    %5 = arith.index_cast %4 : i32 to index
    %c0 = arith.constant 0 : index
    %6 = vector.load %arg3[%5, %c0] : memref<8x32xf32, #tpu.memory_space<vmem>>, vector<8x32xf32>
    %c0_1 = arith.constant 0 : index
    %c0_2 = arith.constant 0 : index
    %7 = vector.load %arg2[%c0_1, %c0_2] : memref<8x32xf32, #tpu.memory_space<vmem>>, vector<8x32xf32>
    %cst = arith.constant dense<0.000000e+00> : vector<8x8xf32>
    %8 = tpu.matmul %7, %6, %cst {dimension_numbers = #tpu.dot_dimension_numbers<[1], [1], [0], [0], [0, 0, 1, 0], [], []>} : vector<8x32xf32>, vector<8x32xf32>, vector<8x8xf32> -> vector<8x8xf32>
    %c0_3 = arith.constant 0 : index
    %c0_4 = arith.constant 0 : index
    %9 = vector.load %arg4[%c0_3, %c0_4] : memref<8x1xi32, #tpu.memory_space<vmem>>, vector<8x1xi32>
    %c0_5 = arith.constant 0 : index
    %c0_6 = arith.constant 0 : index
    %10 = vector.load %arg5[%c0_5, %c0_6] : memref<1x8xi32, #tpu.memory_space<vmem>>, vector<1x8xi32>
    %11 = vector.broadcast %9 : vector<8x1xi32> to vector<8x8xi32>
    %12 = vector.broadcast %10 : vector<1x8xi32> to vector<8x8xi32>
    %13 = arith.cmpi eq, %11, %12 : vector<8x8xi32>
    %14 = arith.cmpi eq, %arg0, %arg1 : i32
    %15 = arith.extui %14 : i1 to i32
    %c0_i32_7 = arith.constant 0 : i32
    %16 = arith.cmpi ne, %15, %c0_i32_7 : i32
    scf.if %16 {
      %c8_i32_11 = arith.constant 8 : i32
      %23 = arith.muli %arg0, %c8_i32_11 : i32
      %24 = tpu.iota {dimensions = array<i32: 0>} : vector<8x8xi32>
      %25 = vector.broadcast %23 : i32 to vector<8x8xi32>
      %26 = arith.addi %25, %24 : vector<8x8xi32>
      %27 = tpu.iota {dimensions = array<i32: 1>} : vector<8x8xi32>
      %28 = vector.broadcast %4 : i32 to vector<8x8xi32>
      %29 = arith.addi %28, %27 : vector<8x8xi32>
      %c8_i32_12 = arith.constant 8 : i32
      %30 = vector.broadcast %c8_i32_12 : i32 to vector<8x8xi32>
      %31 = arith.cmpi slt, %29, %30 : vector<8x8xi32>
      %32 = arith.cmpi ne, %26, %29 : vector<8x8xi32>
      %33 = arith.andi %31, %32 : vector<8x8xi1>
      %cst_13 = arith.constant -1.000000e+30 : f32
      %34 = vector.broadcast %cst_13 : f32 to vector<8x8xf32>
      %35 = arith.select %33, %8, %34 : vector<8x8xi1>, vector<8x8xf32>
      %36 = arith.andi %13, %33 : vector<8x8xi1>
      %c0_14 = arith.constant 0 : index
      %c0_15 = arith.constant 0 : index
      %37 = vector.load %arg7[%c0_14, %c0_15] : memref<8x1xf32, #tpu.memory_space<vmem>>, vector<8x1xf32>
      %cst_16 = arith.constant dense<0xFF800000> : vector<8xf32>
      %38 = vector.multi_reduction <maximumf>, %35, %cst_16 [1] : vector<8x8xf32> to vector<8xf32>
      %39 = vector.shape_cast %38 : vector<8xf32> to vector<8x1xf32>
      %40 = arith.maximumf %37, %39 : vector<8x1xf32>
      %41 = arith.subf %37, %40 : vector<8x1xf32>
      %42 = math.exp %41 : vector<8x1xf32>
      %43 = vector.broadcast %40 : vector<8x1xf32> to vector<8x8xf32>
      %44 = arith.subf %35, %43 : vector<8x8xf32>
      %45 = math.exp %44 : vector<8x8xf32>
      %cst_17 = arith.constant 0.000000e+00 : f32
      %46 = vector.broadcast %cst_17 : f32 to vector<8x8xf32>
      %47 = arith.select %33, %45, %46 : vector<8x8xi1>, vector<8x8xf32>
      %c0_18 = arith.constant 0 : index
      %c0_19 = arith.constant 0 : index
      %48 = vector.load %arg8[%c0_18, %c0_19] : memref<8x1xf32, #tpu.memory_space<vmem>>, vector<8x1xf32>
      %49 = arith.mulf %48, %42 : vector<8x1xf32>
      %cst_20 = arith.constant dense<0.000000e+00> : vector<8xf32>
      %50 = vector.multi_reduction <add>, %47, %cst_20 [1] : vector<8x8xf32> to vector<8xf32>
      %51 = vector.shape_cast %50 : vector<8xf32> to vector<8x1xf32>
      %52 = arith.addf %49, %51 : vector<8x1xf32>
      %c0_21 = arith.constant 0 : index
      %c0_22 = arith.constant 0 : index
      %53 = vector.load %arg8[%c0_21, %c0_22] : memref<8x1xf32, #tpu.memory_space<vmem>>, vector<8x1xf32>
      tpu.vector_store %arg8[%c0_21, %c0_22], %52 {strides = array<i32>} : memref<8x1xf32, #tpu.memory_space<vmem>>, vector<8x1xf32>,
      %c0_23 = arith.constant 0 : index
      %c0_24 = arith.constant 0 : index
      %54 = vector.load %arg7[%c0_23, %c0_24] : memref<8x1xf32, #tpu.memory_space<vmem>>, vector<8x1xf32>
      tpu.vector_store %arg7[%c0_23, %c0_24], %40 {strides = array<i32>} : memref<8x1xf32, #tpu.memory_space<vmem>>, vector<8x1xf32>,
      %c0_25 = arith.constant 0 : index
      %c0_26 = arith.constant 0 : index
      %55 = vector.load %arg9[%c0_25, %c0_26] : memref<8x1xf32, #tpu.memory_space<vmem>>, vector<8x1xf32>
      %cst_27 = arith.constant 0.000000e+00 : f32
      %56 = vector.broadcast %cst_27 : f32 to vector<8x8xf32>
      %57 = arith.select %36, %35, %56 : vector<8x8xi1>, vector<8x8xf32>
      %cst_28 = arith.constant dense<0.000000e+00> : vector<8xf32>
      %58 = vector.multi_reduction <add>, %57, %cst_28 [1] : vector<8x8xf32> to vector<8xf32>
      %59 = vector.shape_cast %58 : vector<8xf32> to vector<8x1xf32>
      %60 = arith.addf %55, %59 : vector<8x1xf32>
      %c0_29 = arith.constant 0 : index
      %c0_30 = arith.constant 0 : index
      %61 = vector.load %arg9[%c0_29, %c0_30] : memref<8x1xf32, #tpu.memory_space<vmem>>, vector<8x1xf32>
      tpu.vector_store %arg9[%c0_29, %c0_30], %60 {strides = array<i32>} : memref<8x1xf32, #tpu.memory_space<vmem>>, vector<8x1xf32>,
      %c0_31 = arith.constant 0 : index
      %c0_32 = arith.constant 0 : index
      %62 = vector.load %arg10[%c0_31, %c0_32] : memref<8x1xf32, #tpu.memory_space<vmem>>, vector<8x1xf32>
      %cst_33 = arith.constant 1.000000e+00 : f32
      %cst_34 = arith.constant 0.000000e+00 : f32
      %63 = vector.broadcast %cst_33 : f32 to vector<8x8xf32>
      %64 = vector.broadcast %cst_34 : f32 to vector<8x8xf32>
      %65 = arith.select %36, %63, %64 : vector<8x8xi1>, vector<8x8xf32>
      %cst_35 = arith.constant dense<0.000000e+00> : vector<8xf32>
      %66 = vector.multi_reduction <add>, %65, %cst_35 [1] : vector<8x8xf32> to vector<8xf32>
      %67 = vector.shape_cast %66 : vector<8xf32> to vector<8x1xf32>
      %68 = arith.addf %62, %67 : vector<8x1xf32>
      %c0_36 = arith.constant 0 : index
      %c0_37 = arith.constant 0 : index
      %69 = vector.load %arg10[%c0_36, %c0_37] : memref<8x1xf32, #tpu.memory_space<vmem>>, vector<8x1xf32>
      tpu.vector_store %arg10[%c0_36, %c0_37], %68 {strides = array<i32>} : memref<8x1xf32, #tpu.memory_space<vmem>>, vector<8x1xf32>,
    } else {
    }
    %true = arith.constant true
    %17 = arith.xori %14, %true : i1
    %18 = arith.extui %17 : i1 to i32
    %c0_i32_8 = arith.constant 0 : i32
    %19 = arith.cmpi ne, %18, %c0_i32_8 : i32
    scf.if %19 {
      %c0_11 = arith.constant 0 : index
      %c0_12 = arith.constant 0 : index
      %23 = vector.load %arg7[%c0_11, %c0_12] : memref<8x1xf32, #tpu.memory_space<vmem>>, vector<8x1xf32>
      %cst_13 = arith.constant dense<0xFF800000> : vector<8xf32>
      %24 = vector.multi_reduction <maximumf>, %8, %cst_13 [1] : vector<8x8xf32> to vector<8xf32>
      %25 = vector.shape_cast %24 : vector<8xf32> to vector<8x1xf32>
      %26 = arith.maximumf %23, %25 : vector<8x1xf32>
      %27 = arith.subf %23, %26 : vector<8x1xf32>
      %28 = math.exp %27 : vector<8x1xf32>
      %29 = vector.broadcast %26 : vector<8x1xf32> to vector<8x8xf32>
      %30 = arith.subf %8, %29 : vector<8x8xf32>
      %31 = math.exp %30 : vector<8x8xf32>
      %c0_14 = arith.constant 0 : index
      %c0_15 = arith.constant 0 : index
      %32 = vector.load %arg8[%c0_14, %c0_15] : memref<8x1xf32, #tpu.memory_space<vmem>>, vector<8x1xf32>
      %33 = arith.mulf %32, %28 : vector<8x1xf32>
      %cst_16 = arith.constant dense<0.000000e+00> : vector<8xf32>
      %34 = vector.multi_reduction <add>, %31, %cst_16 [1] : vector<8x8xf32> to vector<8xf32>
      %35 = vector.shape_cast %34 : vector<8xf32> to vector<8x1xf32>
      %36 = arith.addf %33, %35 : vector<8x1xf32>
      %c0_17 = arith.constant 0 : index
      %c0_18 = arith.constant 0 : index
      %37 = vector.load %arg8[%c0_17, %c0_18] : memref<8x1xf32, #tpu.memory_space<vmem>>, vector<8x1xf32>
      tpu.vector_store %arg8[%c0_17, %c0_18], %36 {strides = array<i32>} : memref<8x1xf32, #tpu.memory_space<vmem>>, vector<8x1xf32>,
      %c0_19 = arith.constant 0 : index
      %c0_20 = arith.constant 0 : index
      %38 = vector.load %arg7[%c0_19, %c0_20] : memref<8x1xf32, #tpu.memory_space<vmem>>, vector<8x1xf32>
      tpu.vector_store %arg7[%c0_19, %c0_20], %26 {strides = array<i32>} : memref<8x1xf32, #tpu.memory_space<vmem>>, vector<8x1xf32>,
      %c0_21 = arith.constant 0 : index
      %c0_22 = arith.constant 0 : index
      %39 = vector.load %arg9[%c0_21, %c0_22] : memref<8x1xf32, #tpu.memory_space<vmem>>, vector<8x1xf32>
      %cst_23 = arith.constant 0.000000e+00 : f32
      %40 = vector.broadcast %cst_23 : f32 to vector<8x8xf32>
      %41 = arith.select %13, %8, %40 : vector<8x8xi1>, vector<8x8xf32>
      %cst_24 = arith.constant dense<0.000000e+00> : vector<8xf32>
      %42 = vector.multi_reduction <add>, %41, %cst_24 [1] : vector<8x8xf32> to vector<8xf32>
      %43 = vector.shape_cast %42 : vector<8xf32> to vector<8x1xf32>
      %44 = arith.addf %39, %43 : vector<8x1xf32>
      %c0_25 = arith.constant 0 : index
      %c0_26 = arith.constant 0 : index
      %45 = vector.load %arg9[%c0_25, %c0_26] : memref<8x1xf32, #tpu.memory_space<vmem>>, vector<8x1xf32>
      tpu.vector_store %arg9[%c0_25, %c0_26], %44 {strides = array<i32>} : memref<8x1xf32, #tpu.memory_space<vmem>>, vector<8x1xf32>,
      %c0_27 = arith.constant 0 : index
      %c0_28 = arith.constant 0 : index
      %46 = vector.load %arg10[%c0_27, %c0_28] : memref<8x1xf32, #tpu.memory_space<vmem>>, vector<8x1xf32>
      %cst_29 = arith.constant 1.000000e+00 : f32
      %cst_30 = arith.constant 0.000000e+00 : f32
      %47 = vector.broadcast %cst_29 : f32 to vector<8x8xf32>
      %48 = vector.broadcast %cst_30 : f32 to vector<8x8xf32>
      %49 = arith.select %13, %47, %48 : vector<8x8xi1>, vector<8x8xf32>
      %cst_31 = arith.constant dense<0.000000e+00> : vector<8xf32>
      %50 = vector.multi_reduction <add>, %49, %cst_31 [1] : vector<8x8xf32> to vector<8xf32>
      %51 = vector.shape_cast %50 : vector<8xf32> to vector<8x1xf32>
      %52 = arith.addf %46, %51 : vector<8x1xf32>
      %c0_32 = arith.constant 0 : index
      %c0_33 = arith.constant 0 : index
      %53 = vector.load %arg10[%c0_32, %c0_33] : memref<8x1xf32, #tpu.memory_space<vmem>>, vector<8x1xf32>
      tpu.vector_store %arg10[%c0_32, %c0_33], %52 {strides = array<i32>} : memref<8x1xf32, #tpu.memory_space<vmem>>, vector<8x1xf32>,
    } else {
    }
    %c0_i32_9 = arith.constant 0 : i32
    %20 = arith.cmpi eq, %arg1, %c0_i32_9 : i32
    %21 = arith.extui %20 : i1 to i32
    %c0_i32_10 = arith.constant 0 : i32
    %22 = arith.cmpi ne, %21, %c0_i32_10 : i32
    scf.if %22 {
      %c0_11 = arith.constant 0 : index
      %c0_12 = arith.constant 0 : index
      %23 = vector.load %arg10[%c0_11, %c0_12] : memref<8x1xf32, #tpu.memory_space<vmem>>, vector<8x1xf32>
      %c0_13 = arith.constant 0 : index
      %c0_14 = arith.constant 0 : index
      %24 = vector.load %arg7[%c0_13, %c0_14] : memref<8x1xf32, #tpu.memory_space<vmem>>, vector<8x1xf32>
      %c0_15 = arith.constant 0 : index
      %c0_16 = arith.constant 0 : index
      %25 = vector.load %arg8[%c0_15, %c0_16] : memref<8x1xf32, #tpu.memory_space<vmem>>, vector<8x1xf32>
      %26 = math.log %25 : vector<8x1xf32>
      %27 = arith.addf %24, %26 : vector<8x1xf32>
      %c0_17 = arith.constant 0 : index
      %c0_18 = arith.constant 0 : index
      %28 = vector.load %arg9[%c0_17, %c0_18] : memref<8x1xf32, #tpu.memory_space<vmem>>, vector<8x1xf32>
      %cst_19 = arith.constant 1.000000e+00 : f32
      %29 = vector.broadcast %cst_19 : f32 to vector<8x1xf32>
      %30 = arith.maximumf %23, %29 : vector<8x1xf32>
      %31 = arith.divf %28, %30 : vector<8x1xf32>
      %c8_i32_20 = arith.constant 8 : i32
      %32 = arith.muli %arg0, %c8_i32_20 : i32
      %33 = tpu.iota {dimensions = array<i32: 0>} : vector<8x1xi32>
      %34 = vector.broadcast %32 : i32 to vector<8x1xi32>
      %35 = arith.addi %34, %33 : vector<8x1xi32>
      %c8_i32_21 = arith.constant 8 : i32
      %36 = vector.broadcast %c8_i32_21 : i32 to vector<8x1xi32>
      %37 = arith.cmpi slt, %35, %36 : vector<8x1xi32>
      %cst_22 = arith.constant 0.000000e+00 : f32
      %38 = vector.broadcast %cst_22 : f32 to vector<8x1xf32>
      %39 = arith.cmpf ogt, %23, %38 : vector<8x1xf32>
      %40 = arith.andi %37, %39 : vector<8x1xi1>
      %41 = arith.subf %31, %27 : vector<8x1xf32>
      %cst_23 = arith.constant 0.000000e+00 : f32
      %42 = vector.broadcast %cst_23 : f32 to vector<8x1xf32>
      %43 = arith.select %40, %41, %42 : vector<8x1xi1>, vector<8x1xf32>
      %c0_24 = arith.constant 0 : index
      %c0_25 = arith.constant 0 : index
      %44 = vector.load %arg6[%c0_24, %c0_25] : memref<8x1xf32, #tpu.memory_space<vmem>>, vector<8x1xf32>
      tpu.vector_store %arg6[%c0_24, %c0_25], %43 {strides = array<i32>} : memref<8x1xf32, #tpu.memory_space<vmem>>, vector<8x1xf32>,
    } else {
    }
    return
  }
  func.func @transform_0(%arg0: i32, %arg1: i32) -> (i32, i32) {
    %c0_i32 = arith.constant 0 : i32
    %c0_i32_0 = arith.constant 0 : i32
    return %arg0, %c0_i32 : i32, i32
  }
  func.func @transform_1(%arg0: i32, %arg1: i32) -> (i32, i32) {
    %c0_i32 = arith.constant 0 : i32
    %c0_i32_0 = arith.constant 0 : i32
    %c0_i32_1 = arith.constant 0 : i32
    return %c0_i32, %c0_i32_0 : i32, i32
  }
  func.func @transform_2(%arg0: i32, %arg1: i32) -> (i32, i32) {
    %c0_i32 = arith.constant 0 : i32
    %c0_i32_0 = arith.constant 0 : i32
    return %arg0, %c0_i32 : i32, i32
  }
  func.func @transform_3(%arg0: i32, %arg1: i32) -> (i32, i32) {
    %c0_i32 = arith.constant 0 : i32
    %c0_i32_0 = arith.constant 0 : i32
    return %c0_i32, %arg1 : i32, i32
  }
  func.func @transform_4(%arg0: i32, %arg1: i32) -> (i32, i32) {
    %c0_i32 = arith.constant 0 : i32
    %c0_i32_0 = arith.constant 0 : i32
    return %arg0, %c0_i32 : i32, i32
  }
}

</mosaic_0001>

<bundles_post_ra>
// kernel: tpu_custom_call.1
= control target key start
LH: loop header
LB: loop body
LE: loop exit
PB: predicated region body
PF: predicated region fallthrough
CT: control target
= control target key end

     0   :  { %9 = vsyncpa [#allocation7], 0  ;;  %s309_s15 = smov [#allocation6]   ;;  %s377_s0 = inlined_call_operand.vmem [shape: f32[8,32], index: 0, kind: input, shape index: {}]   ;;  %s378_s1 = inlined_call_operand.hbm [shape: f32[8,32], index: 1, kind: input, shape index: {}]   ;;  %s379_s2 = inlined_call_operand.vmem [shape: s32[8,1], index: 2, kind: input, shape index: {}]   ;;  %s380_s3 = inlined_call_operand.vmem [shape: s32[1,8], index: 3, kind: input, shape index: {}]   ;;  %s381_s4 = inlined_call_operand.vmem [shape: f32[8,1], index: 4, kind: output, shape index: {}]  }
   0x1   :  { %s18_s16 = sshll.u32 %s309_s15, 4  ;;  %s19_s16 = int_to_ptr.vmem [resolvable:$true] %s18_s16 }
   0x2   :  { %s295_s17 = scalar_lea.vmem %s19_s16, 128  ;;  %p300_p1 = scmp.lt.s32.totalorder %s19_s16, %s19_s16 }
   0x3   :  { %p296_p0 = scmp.ne.s32.totalorder %s19_s16, %s295_s17  ;;  %p301_p2 = scmp.lt.s32.totalorder %s295_s17, %s295_s17 }
   0x5   :  { %p302_p3 = por %p301_p2, %p300_p1 }
   0x7   :  { %p303_p4 = pnand %p302_p3, %p296_p0 }
   0x9   :  { %306 = shalt.err (!%p303_p4)
}
   0xa   :  { %21 = dma.hbm_to_vmem [thread:$0]  %s378_s1, 128, %s19_s16, [#allocation7]  }
   0xb   :  { %307 = dma.done.wait [#allocation7], 128  }
   0xc   :  { %308 = vsyncadd [#allocation7], 4294967168  ;;  %v310_v0 = vmov 0.0   ;;  %vm311_vm0 = vmmov 0   ;;  %v312_v1 = vmov 0   ;;  %vm42_vm1 = vcmask 261120  }
   0xd   :  { %267 = vmatprep.subr.mxu0 %v310_v0  ;;  %269 = vmatprep.mubr.msk.f32.mxu0 %vm311_vm0, %v310_v0  ;;  %v40_v2 = vld [vmem:[#allocation6] sm:$0xff]  ;;  %vm33_vm2 = vcmask 7168   ;;  %v313_v5 = vmov -1e+30   ;;  %v134_v6 = vlaneseq  ;;  %vm148_vm6 = vcmask 64512  }
   0xe   :  { %278 = vset.pattern.permute.xlu1 %v312_v1  ;;  %277 = vset.pattern.permute.xlu0 %v312_v1  ;;  %v119_v3 = vld [vmem:[%s379_s2] sm:$0xff]  ;;  %34 = vst.msk [vmem:[#allocation2] sm:$0xff] %vm33_vm2, %v313_v5  ;;  %35 = vst.msk [vmem:[#allocation3] sm:$0xff] %vm33_vm2, %v310_v0 }
   0xf   :  { %268 = vmatpush3.xpose.msk.msra.mxu0 %vm42_vm1, %v40_v2  ;;  %v41_v4 = vld [vmem:[%s377_s0] sm:$0xff]  ;;  %122 = vperm.xlu1 %278, %v119_v3   ;;  %36 = vst.msk [vmem:[#allocation4] sm:$0xff] %vm33_vm2, %v310_v0  ;;  %37 = vst.msk [vmem:[#allocation5] sm:$0xff] %vm33_vm2, %v310_v0  ;;  %v135_v7 = vshrl.u32 %v134_v6, 7  ;;  %v139_v8 = vand.u32 127, %v134_v6 }
  0x10   :  { %v264_v21 = vld [vmem:[%s380_s3] ss:$0 sm:$0xff] }
  0x11   :  { %vm142_vm3 = vcmp.lt.s32.totalorder %v139_v8, 8  ;;  %vm143_vm4 = vcmp.ne.s32.totalorder %v135_v7, %v139_v8 }
  0x12   :  { %270 = vmatmul.mubr.msk.f32.vlgmr.msra.gmra.mxu0 %vm42_vm1, %v41_v4  ;;  %vm352_vm5 = vmand %vm142_vm3, %vm143_vm4 }
  0x15   :  { %v147_v14 = vld [vmem:[#allocation2] sm:$0xff]  ;;  %v165_v32 = vld [vmem:[#allocation3] sm:$0xff] }
  0x16   :  { %v181_v36 = vld [vmem:[#allocation5] sm:$0xff]  ;;  %v174_v39 = vld [vmem:[#allocation4] sm:$0xff] }
  0x8a   :  { %v123_v22 = vpop.permute.xlu1 %122 }
  0x8b   :  { %vm128_vm7 = vcmp.eq.s32.totalorder %v123_v22, %v264_v21 }
  0x8c   :  { %vm146_vm8 = vmand %vm128_vm7, %vm352_vm5 }
  0x8d   :  { %v182_v25 = vsel %vm146_vm8, 1.0, %v310_v0 }
  0x8e   :  { %v183_v27 = vsel %vm148_vm6, %v182_v25, 0.0 }
  0xd2   :  { %v115_v10 = vpop.f32.mrf.mxu0 }
  0xd3   :  { %v145_v11 = vsel %vm352_vm5, %v115_v10, -1e+30 }
  0xd4   :  { %v271_v12 = vpop.f32.mrf.mxu0  ;;  %v149_v13 = vsel %vm148_vm6, %v145_v11, -inf  ;;  %v175_v28 = vsel %vm146_vm8, %v145_v11, 0.0 }
  0xd5   :  { %150 = vmax.xlane.f32.xlu0 %v149_v13  ;;  %v176_v29 = vsel %vm148_vm6, %v175_v28, 0.0 }
 0x15e   :  { %v151_v15 = vpop.xlane.xlu0 %150 }
 0x15f   :  { %v152_v16 = vmax.f32 %v147_v14, %v151_v15 }
 0x161   :  { %v153_v17 = vsub.f32 %v147_v14, %v152_v16  ;;  %173 = vst.msk [vmem:[#allocation2] sm:$0xff] %vm33_vm2, %v152_v16  ;;  %158 = vperm.xlu0 %277, %v152_v16  }
 0x163   :  { %v154_v30 = vmul.f32 1.442695, %v153_v17 }
 0x168   :  { %v236_v48 = vld [vmem:[#allocation2] sm:$0xff] }
 0x1dc   :  { %v159_v18 = vpop.permute.xlu0 %158 }
 0x1dd   :  { %v161_v19 = vsub.f32 %v145_v11, %v159_v18 }
 0x1df   :  { %v162_v20 = vmul.f32 1.442695, %v161_v19 }
 0x1e1   :  { %279 = vpow2.f32 %v162_v20 }
 0x1e2   :  { %281 = vpow2.f32 %v154_v30 }
 0x1ee   :  { %v280_v23 = vpop.eup %279 }
 0x1ef   :  { %v164_v24 = vsel %vm352_vm5, %v280_v23, 0.0  ;;  %v282_v31 = vpop.eup %281 }
 0x1f0   :  { %v167_v26 = vsel %vm148_vm6, %v164_v24, 0.0  ;;  %v166_v33 = vmul.f32 %v282_v31, %v165_v32 }
 0x1f1   :  { %168 = vadd.xlane.f32.xlu1 %v167_v26 }
 0x1f5   :  { %184 = vadd.xlane.f32.xlu1 %v183_v27 }
 0x1f9   :  { %177 = vadd.xlane.f32.xlu1 %v176_v29 }
 0x27a   :  { %v169_v34 = vpop.xlane.xlu1 %168 }
 0x27b   :  { %v170_v35 = vadd.f32 %v169_v34, %v166_v33 }
 0x27d   :  { %172 = vst.msk [vmem:[#allocation3] sm:$0xff] %vm33_vm2, %v170_v35 }
 0x27e   :  { %v185_v37 = vpop.xlane.xlu1 %184 }
 0x27f   :  { %v186_v38 = vadd.f32 %v185_v37, %v181_v36 }
 0x281   :  { %187 = vst.msk [vmem:[#allocation5] sm:$0xff] %vm33_vm2, %v186_v38 }
 0x282   :  { %v178_v40 = vpop.xlane.xlu1 %177 }
 0x283   :  { %v179_v41 = vadd.f32 %v178_v40, %v174_v39 }
 0x284   :  { %v237_v42 = vld [vmem:[#allocation3] sm:$0xff] }
 0x285   :  { %283 = vlog2.f32 %v237_v42  ;;  %180 = vst.msk [vmem:[#allocation4] sm:$0xff] %vm33_vm2, %v179_v41 }
 0x288   :  { %v235_v43 = vld [vmem:[#allocation5] sm:$0xff] }
 0x289   :  { %v242_v44 = vmax.f32 %v235_v43, 1.0  ;;  %vm251_vm9 = vcmp.gt.f32.partialorder %v235_v43, 0.0 }
 0x28b   :  { %285 = vrcp.f32 %v242_v44 }
 0x28c   :  { %v241_v49 = vld [vmem:[#allocation4] sm:$0xff] }
 0x292   :  { %v284_v45 = vpop.eup %283 }
 0x293   :  { %v239_v46 = vmul.f32 0.6931472, %v284_v45 }
 0x295   :  { %v240_v50 = vadd.f32 %v239_v46, %v236_v48 }
 0x298   :  { %v286_v47 = vpop.eup %285 }
 0x299   :  { %v244_v51 = vmul.f32 %v286_v47, %v241_v49 }
 0x29b   :  { %v253_v52 = vsub.f32 %v244_v51, %v240_v50 }
 0x29d   :  { %v254_v53 = vsel %vm251_vm9, %v253_v52, 0.0 }
 0x29e   :  { %256 = vst.msk [vmem:[%s381_s4] sm:$0xff] %vm33_vm2, %v254_v53 }
 0x29f   :  { %261 = vsyncpa [#allocation7], 1 }

</bundles_post_ra>
